<compile_context>
chip_gen: v5e
topology: v5e:2x2
jax: 0.10.0
libtpu: 0.0.40
codegen_flags: <defaults>
</compile_context>

<pallas_src>
import math

import jax
import jax.numpy as jnp
from jax import lax
from jax.experimental import pallas as pl
from jax.experimental.pallas import tpu as pltpu

_EPS = 1e-5
_INV_SQRT2 = 1.0 / math.sqrt(2.0)


def _gelu_exact(x):
    # nn.GELU() default: 0.5 * x * (1 + erf(x / sqrt(2)))
    return 0.5 * x * (1.0 + lax.erf(x * _INV_SQRT2))


# --------------------------- fused kernel ------------------------------------
# grid = (stage, j, k); stage 0: H = GELU(BN1(X @ W1)) -> h scratch
#                        stage 1: Y = GELU(X + BN2(H @ W2)) -> output
def _fused_resblock_kernel(x_ref, w_ref, bn_ref, o_ref, acc_ref, h_ref):
    s = pl.program_id(0)
    k = pl.program_id(2)
    nk = pl.num_programs(2)
    TK = w_ref.shape[0]           # contraction tile (static)
    TN = o_ref.shape[1]           # output-feature tile (static)
    k0 = pl.multiple_of(k * TK, TK)
    j0 = pl.multiple_of(pl.program_id(1) * TN, TN)

    @pl.when(k == 0)
    def _():
        acc_ref[...] = jnp.zeros_like(acc_ref)

    # bf16 x bf16 -> f32 accumulate on the MXU.
    @pl.when(s == 0)
    def _():
        lhs = x_ref[:, pl.ds(k0, TK)].astype(jnp.bfloat16)
        acc_ref[...] += jnp.dot(lhs, w_ref[...],
                                preferred_element_type=jnp.float32)

    @pl.when(s == 1)
    def _():
        lhs = h_ref[:, pl.ds(k0, TK)]                       # bf16 scratch panel
        acc_ref[...] += jnp.dot(lhs, w_ref[...],
                                preferred_element_type=jnp.float32)

    @pl.when(k == nk - 1)
    def _():
        a = acc_ref[...]
        gamma = bn_ref[0:1, :]
        beta = bn_ref[1:2, :]
        # Training-mode BN, centered two-pass variance (robust to cancellation),
        # folded to a single multiply-add per element.
        mean = jnp.mean(a, axis=0, keepdims=True)
        c = a - mean
        var = jnp.mean(c * c, axis=0, keepdims=True)        # biased batch variance
        bn_out = c * (gamma * lax.rsqrt(var + _EPS)) + beta

        @pl.when(s == 0)
        def _():
            g = _gelu_exact(bn_out)
            h_ref[:, pl.ds(j0, TN)] = g.astype(h_ref.dtype)
            # Keep the output buffer defined for any intermediate writeback;
            # stage 1 overwrites the same HBM block with the final values.
            o_ref[...] = g.astype(o_ref.dtype)

        @pl.when(s == 1)
        def _():
            resid = x_ref[:, pl.ds(j0, TN)]
            o_ref[...] = _gelu_exact(resid + bn_out).astype(o_ref.dtype)


# --------------------------- host-side wrapper --------------------------------
def _pick_tiles(d):
    """(tn, tk): lane-dense output tile and a large contraction tile."""
    if d % 256 == 0 and d >= 512:
        tn = 256
    elif d % 128 == 0:
        tn = 128
    else:
        tn = d                                   # full dim (non-aligned D)
    if d % 128 != 0 or d <= 1024:
        tk = d                                   # whole contraction per step
    else:
        tk = next(t for t in (1024, 512, 256, 128) if d % t == 0)
    return tn, tk


def _vmem_limit_bytes(B, D, TN, TK, out_itemsize):
    need = (
        2 * B * D * 4            # resident x (count double-buffered to be safe)
        + B * D * 2              # H scratch (bf16)
        + B * TN * 4             # accumulator scratch
        + 2 * TK * TN * 2        # double-buffered bf16 weight tile
        + 2 * 2 * TN * 4         # double-buffered BN params
        + 2 * B * TN * out_itemsize  # double-buffered output block
    )
    return int(min(max(need + (16 << 20), 32 << 20), 100 << 20))


def prepare_resblock_params(w1, b1, g1, be1, w2, b2, g2, be2):
    """One-time packing, OUTSIDE the per-call forward (no per-call cast passes).

    w1/w2: [in, out] (PyTorch weight.T). b1/b2 are accepted for API parity but are
    mathematically dead: training-mode BatchNorm subtracts the per-feature batch
    mean right after each Linear, cancelling any per-feature bias exactly.
    """
    del b1, b2
    w_packed = jnp.stack([w1, w2], axis=0).astype(jnp.bfloat16)          # [2, D, D]
    bn_packed = jnp.stack([jnp.stack([g1, be1], axis=0),
                           jnp.stack([g2, be2], axis=0)], axis=0)        # [2, 2, D] f32
    return w_packed, jnp.asarray(bn_packed, jnp.float32)


@jax.jit
def resblock_forward(x, w_packed, bn_packed):
    """x: [B, D] f32; w_packed: [2, D, D] bf16; bn_packed: [2, 2, D] f32."""
    B, D = x.shape
    assert w_packed.shape == (2, D, D) and bn_packed.shape == (2, 2, D)
    TN, TK = _pick_tiles(D)
    J, K = D // TN, D // TK
    grid = (2, J, K)                            # (stage, out-feature tile, k tile)

    return pl.pallas_call(
        _fused_resblock_kernel,
        out_shape=jax.ShapeDtypeStruct((B, D), x.dtype),
        grid_spec=pltpu.PrefetchScalarGridSpec(
            num_scalar_prefetch=0,
            grid=grid,
            in_specs=[
                # x: whole array resident, constant block index -> DMA'd once.
                pl.BlockSpec((B, D), lambda s, j, k: (0, 0)),
                # packed weights [stage, in, out]: only the needed stage tile is DMA'd.
                pl.BlockSpec((None, TK, TN), lambda s, j, k: (s, k, j)),
                # packed BN params [stage, {gamma,beta}, D].
                pl.BlockSpec((None, 2, TN), lambda s, j, k: (s, 0, j)),
            ],
            out_specs=pl.BlockSpec((B, TN), lambda s, j, k: (0, j)),
            scratch_shapes=[
                pltpu.VMEM((B, TN), jnp.float32),    # matmul accumulator
                pltpu.VMEM((B, D), jnp.bfloat16),    # intermediate H (persists)
            ],
        ),
        compiler_params=pltpu.CompilerParams(
            # Stage 1 depends on all of stage 0's H (shared scratch) -> sequential.
            dimension_semantics=("arbitrary", "arbitrary", "arbitrary"),
            vmem_limit_bytes=_vmem_limit_bytes(B, D, TN, TK, x.dtype.itemsize),
        ),
    )(x, w_packed, bn_packed)


# ---------------- references for the test -----------------------------------
def _reference_f32(x, w1, b1, g1, be1, w2, b2, g2, be2):
    """Exact PyTorch-semantics reference in f32 (with the Linear biases)."""
    def bn(h, g, be):
        m = jnp.mean(h, axis=0, keepdims=True)
        v = jnp.mean((h - m) ** 2, axis=0, keepdims=True)
        return (h - m) / jnp.sqrt(v + _EPS) * g + be

    h = x @ w1 + b1
    h = jax.nn.gelu(bn(h, g1, be1), approximate=False)
    h = h @ w2 + b2
    h = bn(h, g2, be2)
    return jax.nn.gelu(x + h, approximate=False)


def _reference_matched(x, w1, g1, be1, w2, g2, be2):
    """Plain-JAX reference with the kernel's precision/algebra choices
    (bf16 MXU operands, bf16 H, centered BN, dead biases dropped)."""
    def bn(h, g, be):
        m = jnp.mean(h, axis=0, keepdims=True)
        c = h - m
        v = jnp.mean(c * c, axis=0, keepdims=True)
        return c * (g * lax.rsqrt(v + _EPS)) + be

    h = jnp.dot(x.astype(jnp.bfloat16), w1.astype(jnp.bfloat16),
                preferred_element_type=jnp.float32)
    h = _gelu_exact(bn(h, g1, be1)).astype(jnp.bfloat16)
    h = jnp.dot(h, w2.astype(jnp.bfloat16), preferred_element_type=jnp.float32)
    h = bn(h, g2, be2)
    return _gelu_exact(x + h)


if __name__ == "__main__":
    B, D = 8, 128  # small shapes: batch on sublanes (8), feature dim on lanes (128)

    key = jax.random.PRNGKey(0)
    kx, kw1, kb1, kw2, kb2 = jax.random.split(key, 5)

    bound = 1.0 / math.sqrt(D)  # nn.Linear default init bound
    x = jax.random.normal(kx, (B, D), dtype=jnp.float32)
    # weights stored as [in, out] (i.e. PyTorch weight.T) so kernels do x @ W
    w1 = jax.random.uniform(kw1, (D, D), jnp.float32, -bound, bound)
    b1 = jax.random.uniform(kb1, (D,), jnp.float32, -bound, bound)
    w2 = jax.random.uniform(kw2, (D, D), jnp.float32, -bound, bound)
    b2 = jax.random.uniform(kb2, (D,), jnp.float32, -bound, bound)
    # BatchNorm1d default affine params
    g1 = jnp.ones((D,), jnp.float32)
    be1 = jnp.zeros((D,), jnp.float32)
    g2 = jnp.ones((D,), jnp.float32)
    be2 = jnp.zeros((D,), jnp.float32)

    # One-time packing/casting (outside the jitted forward).
    w_packed, bn_packed = prepare_resblock_params(w1, b1, g1, be1, w2, b2, g2, be2)

    out = jax.block_until_ready(resblock_forward(x, w_packed, bn_packed))
    assert out.shape == (B, D) and out.dtype == x.dtype

    # Tight check of kernel logic against a precision-matched JAX reference.
    ref_m = _reference_matched(x, w1, g1, be1, w2, g2, be2)
    err_m = float(jnp.max(jnp.abs(out - ref_m)))
    assert jnp.allclose(out, ref_m, atol=2e-2, rtol=2e-2), (
        f"mismatch vs precision-matched reference, max abs err {err_m:.3e}")

    # Loose check against exact f32 module semantics (bf16 MXU operands and the
    # dropped-but-mathematically-dead biases introduce ~1e-2-level deviation).
    ref = _reference_f32(x, w1, b1, g1, be1, w2, b2, g2, be2)
    err = float(jnp.max(jnp.abs(out - ref)))
    assert jnp.allclose(out, ref, atol=1e-1, rtol=1e-1), (
        f"mismatch vs f32 reference, max abs err {err:.3e}")

    print("KERNEL_OK")
</pallas_src>

<mosaic_0001>
module attributes {stable_mosaic.version = 11 : i64} {
  func.func @_fused_resblock_kernel(%arg0: i32, %arg1: i32, %arg2: i32, %arg3: memref<8x128xf32, #tpu.memory_space<vmem>>, %arg4: memref<1x128x128xbf16, #tpu.memory_space<vmem>>, %arg5: memref<1x2x128xf32, #tpu.memory_space<vmem>>, %arg6: memref<8x128xf32, #tpu.memory_space<vmem>>, %arg7: memref<8x128xf32, #tpu.memory_space<vmem>>, %arg8: memref<8x128xbf16, #tpu.memory_space<vmem>>) attributes {dimension_semantics = [#tpu.dimension_semantics<arbitrary>, #tpu.dimension_semantics<arbitrary>, #tpu.dimension_semantics<arbitrary>], iteration_bounds = array<i64: 2, 1, 1>, scalar_prefetch = 0 : i64, scratch_operands = 2 : i64, tpu.core_type = #tpu.core_type<tc>, window_params = [{pipeline_mode = #tpu.pipeline_mode<synchronous>, transform_indices = @transform_0, window_bounds = array<i64: 8, 128>}, {transform_indices = @transform_1, window_bounds = array<i64: 1, 128, 128>}, {transform_indices = @transform_2, window_bounds = array<i64: 1, 2, 128>}, {transform_indices = @transform_3, window_bounds = array<i64: 8, 128>}]} {
    %c128_i32 = arith.constant 128 : i32
    %0 = arith.muli %arg2, %c128_i32 : i32
    %1 = tpu.assume_multiple %0, 128 : i32
    %c128_i32_0 = arith.constant 128 : i32
    %2 = arith.muli %arg1, %c128_i32_0 : i32
    %3 = tpu.assume_multiple %2, 128 : i32
    %c0_i32 = arith.constant 0 : i32
    %4 = arith.cmpi eq, %arg2, %c0_i32 : i32
    %5 = arith.extui %4 : i1 to i32
    %c0_i32_1 = arith.constant 0 : i32
    %6 = arith.cmpi ne, %5, %c0_i32_1 : i32
    scf.if %6 {
      %cst = arith.constant 0.000000e+00 : f32
      %16 = vector.broadcast %cst : f32 to vector<8x128xf32>
      %c0 = arith.constant 0 : index
      %c0_7 = arith.constant 0 : index
      %17 = vector.load %arg7[%c0, %c0_7] : memref<8x128xf32, #tpu.memory_space<vmem>>, vector<8x128xf32>
      tpu.vector_store %arg7[%c0, %c0_7], %16 {strides = array<i32>} : memref<8x128xf32, #tpu.memory_space<vmem>>, vector<8x128xf32>,
    } else {
    }
    %c0_i32_2 = arith.constant 0 : i32
    %7 = arith.cmpi eq, %arg0, %c0_i32_2 : i32
    %8 = arith.extui %7 : i1 to i32
    %c0_i32_3 = arith.constant 0 : i32
    %9 = arith.cmpi ne, %8, %c0_i32_3 : i32
    scf.if %9 {
      %c0 = arith.constant 0 : index
      %16 = arith.index_cast %1 : i32 to index
      %17 = vector.load %arg3[%c0, %16] : memref<8x128xf32, #tpu.memory_space<vmem>>, vector<8x128xf32>
      %18 = arith.truncf %17 : vector<8x128xf32> to vector<8x128xbf16>
      %c0_7 = arith.constant 0 : index
      %c0_8 = arith.constant 0 : index
      %19 = vector.load %arg7[%c0_7, %c0_8] : memref<8x128xf32, #tpu.memory_space<vmem>>, vector<8x128xf32>
      %c0_9 = arith.constant 0 : index
      %c0_10 = arith.constant 0 : index
      %c0_11 = arith.constant 0 : index
      %20 = vector.load %arg4[%c0_9, %c0_10, %c0_11] : memref<1x128x128xbf16, #tpu.memory_space<vmem>>, vector<1x128x128xbf16>
      %21 = vector.shape_cast %20 : vector<1x128x128xbf16> to vector<128x128xbf16>
      %cst = arith.constant dense<0.000000e+00> : vector<8x128xf32>
      %22 = tpu.matmul %18, %21, %cst {dimension_numbers = #tpu.dot_dimension_numbers<[1], [0], [0], [1], [0, 0, 1, 1], [], []>} : vector<8x128xbf16>, vector<128x128xbf16>, vector<8x128xf32> -> vector<8x128xf32>
      %23 = arith.addf %19, %22 : vector<8x128xf32>
      %c0_12 = arith.constant 0 : index
      %c0_13 = arith.constant 0 : index
      %24 = vector.load %arg7[%c0_12, %c0_13] : memref<8x128xf32, #tpu.memory_space<vmem>>, vector<8x128xf32>
      tpu.vector_store %arg7[%c0_12, %c0_13], %23 {strides = array<i32>} : memref<8x128xf32, #tpu.memory_space<vmem>>, vector<8x128xf32>,
    } else {
    }
    %c1_i32 = arith.constant 1 : i32
    %10 = arith.cmpi eq, %arg0, %c1_i32 : i32
    %11 = arith.extui %10 : i1 to i32
    %c0_i32_4 = arith.constant 0 : i32
    %12 = arith.cmpi ne, %11, %c0_i32_4 : i32
    scf.if %12 {
      %c0 = arith.constant 0 : index
      %16 = arith.index_cast %1 : i32 to index
      %17 = vector.load %arg8[%c0, %16] : memref<8x128xbf16, #tpu.memory_space<vmem>>, vector<8x128xbf16>
      %c0_7 = arith.constant 0 : index
      %c0_8 = arith.constant 0 : index
      %18 = vector.load %arg7[%c0_7, %c0_8] : memref<8x128xf32, #tpu.memory_space<vmem>>, vector<8x128xf32>
      %c0_9 = arith.constant 0 : index
      %c0_10 = arith.constant 0 : index
      %c0_11 = arith.constant 0 : index
      %19 = vector.load %arg4[%c0_9, %c0_10, %c0_11] : memref<1x128x128xbf16, #tpu.memory_space<vmem>>, vector<1x128x128xbf16>
      %20 = vector.shape_cast %19 : vector<1x128x128xbf16> to vector<128x128xbf16>
      %cst = arith.constant dense<0.000000e+00> : vector<8x128xf32>
      %21 = tpu.matmul %17, %20, %cst {dimension_numbers = #tpu.dot_dimension_numbers<[1], [0], [0], [1], [0, 0, 1, 1], [], []>} : vector<8x128xbf16>, vector<128x128xbf16>, vector<8x128xf32> -> vector<8x128xf32>
      %22 = arith.addf %18, %21 : vector<8x128xf32>
      %c0_12 = arith.constant 0 : index
      %c0_13 = arith.constant 0 : index
      %23 = vector.load %arg7[%c0_12, %c0_13] : memref<8x128xf32, #tpu.memory_space<vmem>>, vector<8x128xf32>
      tpu.vector_store %arg7[%c0_12, %c0_13], %22 {strides = array<i32>} : memref<8x128xf32, #tpu.memory_space<vmem>>, vector<8x128xf32>,
    } else {
    }
    %c0_i32_5 = arith.constant 0 : i32
    %13 = arith.cmpi eq, %arg2, %c0_i32_5 : i32
    %14 = arith.extui %13 : i1 to i32
    %c0_i32_6 = arith.constant 0 : i32
    %15 = arith.cmpi ne, %14, %c0_i32_6 : i32
    scf.if %15 {
      %c0 = arith.constant 0 : index
      %c0_7 = arith.constant 0 : index
      %16 = vector.load %arg7[%c0, %c0_7] : memref<8x128xf32, #tpu.memory_space<vmem>>, vector<8x128xf32>
      %c0_8 = arith.constant 0 : index
      %c0_9 = arith.constant 0 : index
      %c0_10 = arith.constant 0 : index
      %17 = vector.load %arg5[%c0_8, %c0_9, %c0_10] : memref<1x2x128xf32, #tpu.memory_space<vmem>>, vector<1x1x128xf32>
      %18 = vector.shape_cast %17 : vector<1x1x128xf32> to vector<1x128xf32>
      %c0_11 = arith.constant 0 : index
      %c1 = arith.constant 1 : index
      %c0_12 = arith.constant 0 : index
      %19 = vector.load %arg5[%c0_11, %c1, %c0_12] : memref<1x2x128xf32, #tpu.memory_space<vmem>>, vector<1x1x128xf32>
      %20 = vector.shape_cast %19 : vector<1x1x128xf32> to vector<1x128xf32>
      %cst = arith.constant dense<0.000000e+00> : vector<128xf32>
      %21 = vector.multi_reduction <add>, %16, %cst [0] : vector<8x128xf32> to vector<128xf32>
      %22 = vector.shape_cast %21 : vector<128xf32> to vector<1x128xf32>
      %cst_13 = arith.constant 8.000000e+00 : f32
      %23 = vector.broadcast %cst_13 : f32 to vector<1x128xf32>
      %24 = arith.divf %22, %23 : vector<1x128xf32>
      %25 = vector.broadcast %24 : vector<1x128xf32> to vector<8x128xf32>
      %26 = arith.subf %16, %25 : vector<8x128xf32>
      %27 = arith.mulf %26, %26 : vector<8x128xf32>
      %cst_14 = arith.constant dense<0.000000e+00> : vector<128xf32>
      %28 = vector.multi_reduction <add>, %27, %cst_14 [0] : vector<8x128xf32> to vector<128xf32>
      %29 = vector.shape_cast %28 : vector<128xf32> to vector<1x128xf32>
      %cst_15 = arith.constant 8.000000e+00 : f32
      %30 = vector.broadcast %cst_15 : f32 to vector<1x128xf32>
      %31 = arith.divf %29, %30 : vector<1x128xf32>
      %cst_16 = arith.constant 9.99999974E-6 : f32
      %32 = vector.broadcast %cst_16 : f32 to vector<1x128xf32>
      %33 = arith.addf %31, %32 : vector<1x128xf32>
      %34 = math.rsqrt %33 : vector<1x128xf32>
      %35 = arith.mulf %18, %34 : vector<1x128xf32>
      %36 = vector.broadcast %35 : vector<1x128xf32> to vector<8x128xf32>
      %37 = arith.mulf %26, %36 : vector<8x128xf32>
      %38 = vector.broadcast %20 : vector<1x128xf32> to vector<8x128xf32>
      %39 = arith.addf %37, %38 : vector<8x128xf32>
      %c0_i32_17 = arith.constant 0 : i32
      %40 = arith.cmpi eq, %arg0, %c0_i32_17 : i32
      %41 = arith.extui %40 : i1 to i32
      %c0_i32_18 = arith.constant 0 : i32
      %42 = arith.cmpi ne, %41, %c0_i32_18 : i32
      scf.if %42 {
        %cst_21 = arith.constant 5.000000e-01 : f32
        %46 = vector.broadcast %cst_21 : f32 to vector<8x128xf32>
        %47 = arith.mulf %46, %39 : vector<8x128xf32>
        %cst_22 = arith.constant 0.707106769 : f32
        %48 = vector.broadcast %cst_22 : f32 to vector<8x128xf32>
        %49 = arith.mulf %39, %48 : vector<8x128xf32>
        %50 = math.erf %49 : vector<8x128xf32>
        %cst_23 = arith.constant 1.000000e+00 : f32
        %51 = vector.broadcast %cst_23 : f32 to vector<8x128xf32>
        %52 = arith.addf %51, %50 : vector<8x128xf32>
        %53 = arith.mulf %47, %52 : vector<8x128xf32>
        %54 = arith.truncf %53 : vector<8x128xf32> to vector<8x128xbf16>
        %c0_24 = arith.constant 0 : index
        %55 = arith.index_cast %3 : i32 to index
        %56 = vector.load %arg8[%c0_24, %55] : memref<8x128xbf16, #tpu.memory_space<vmem>>, vector<8x128xbf16>
        tpu.vector_store %arg8[%c0_24, %55], %54 {strides = array<i32>} : memref<8x128xbf16, #tpu.memory_space<vmem>>, vector<8x128xbf16>,
        %c0_25 = arith.constant 0 : index
        %c0_26 = arith.constant 0 : index
        %57 = vector.load %arg6[%c0_25, %c0_26] : memref<8x128xf32, #tpu.memory_space<vmem>>, vector<8x128xf32>
        tpu.vector_store %arg6[%c0_25, %c0_26], %53 {strides = array<i32>} : memref<8x128xf32, #tpu.memory_space<vmem>>, vector<8x128xf32>,
      } else {
      }
      %c1_i32_19 = arith.constant 1 : i32
      %43 = arith.cmpi eq, %arg0, %c1_i32_19 : i32
      %44 = arith.extui %43 : i1 to i32
      %c0_i32_20 = arith.constant 0 : i32
      %45 = arith.cmpi ne, %44, %c0_i32_20 : i32
      scf.if %45 {
        %c0_21 = arith.constant 0 : index
        %46 = arith.index_cast %3 : i32 to index
        %47 = vector.load %arg3[%c0_21, %46] : memref<8x128xf32, #tpu.memory_space<vmem>>, vector<8x128xf32>
        %48 = arith.addf %47, %39 : vector<8x128xf32>
        %cst_22 = arith.constant 5.000000e-01 : f32
        %49 = vector.broadcast %cst_22 : f32 to vector<8x128xf32>
        %50 = arith.mulf %49, %48 : vector<8x128xf32>
        %cst_23 = arith.constant 0.707106769 : f32
        %51 = vector.broadcast %cst_23 : f32 to vector<8x128xf32>
        %52 = arith.mulf %48, %51 : vector<8x128xf32>
        %53 = math.erf %52 : vector<8x128xf32>
        %cst_24 = arith.constant 1.000000e+00 : f32
        %54 = vector.broadcast %cst_24 : f32 to vector<8x128xf32>
        %55 = arith.addf %54, %53 : vector<8x128xf32>
        %56 = arith.mulf %50, %55 : vector<8x128xf32>
        %c0_25 = arith.constant 0 : index
        %c0_26 = arith.constant 0 : index
        %57 = vector.load %arg6[%c0_25, %c0_26] : memref<8x128xf32, #tpu.memory_space<vmem>>, vector<8x128xf32>
        tpu.vector_store %arg6[%c0_25, %c0_26], %56 {strides = array<i32>} : memref<8x128xf32, #tpu.memory_space<vmem>>, vector<8x128xf32>,
      } else {
      }
    } else {
    }
    return
  }
  func.func @transform_0(%arg0: i32, %arg1: i32, %arg2: i32) -> (i32, i32) {
    %c0_i32 = arith.constant 0 : i32
    %c0_i32_0 = arith.constant 0 : i32
    %c0_i32_1 = arith.constant 0 : i32
    return %c0_i32, %c0_i32_0 : i32, i32
  }
  func.func @transform_1(%arg0: i32, %arg1: i32, %arg2: i32) -> (i32, i32, i32) {
    %c0_i32 = arith.constant 0 : i32
    return %arg0, %arg2, %arg1 : i32, i32, i32
  }
  func.func @transform_2(%arg0: i32, %arg1: i32, %arg2: i32) -> (i32, i32, i32) {
    %c0_i32 = arith.constant 0 : i32
    %c0_i32_0 = arith.constant 0 : i32
    return %arg0, %c0_i32, %arg1 : i32, i32, i32
  }
  func.func @transform_3(%arg0: i32, %arg1: i32, %arg2: i32) -> (i32, i32) {
    %c0_i32 = arith.constant 0 : i32
    %c0_i32_0 = arith.constant 0 : i32
    return %c0_i32, %arg1 : i32, i32
  }
}

</mosaic_0001>

<bundles_post_ra>
// kernel: resblock_forward.1
= control target key start
LH: loop header
LB: loop body
LE: loop exit
PB: predicated region body
PF: predicated region fallthrough
CT: control target
= control target key end

     0   :  { %8 = vsyncpa [#allocation5], 0  ;;  %s1282_s0 = inlined_call_operand.hbm [shape: f32[8,128], index: 0, kind: input, shape index: {}]   ;;  %s1283_s1 = inlined_call_operand.hbm [shape: bf16[2,128,128], index: 1, kind: input, shape index: {}]   ;;  %s1284_s2 = inlined_call_operand.hbm [shape: f32[2,2,128], index: 2, kind: input, shape index: {}]   ;;  %s1285_s3 = inlined_call_operand.hbm [shape: f32[8,128], index: 3, kind: output, shape index: {}]  }
   0x1   :  { %9 = vsyncpa [#allocation8], 0 }
   0x2   :  { %11 = vsyncpa [#allocation8 + $0x1], 0 }
   0x3   :  { %12 = vsyncpa [#allocation6], 0  ;;  %s1119_s12 = smov 0   ;;  %s1121_s13 = smov 0  }
   0x4   :  { %s1123_s14 = smov 0   ;;  %s1125_s15 = smov 0  }
   0x5   :  { %s1127_s16 = smov 0   ;;  %s1129_s17 = smov 0  }
   0x6 LB: > { %s37_s18 = sadd.s32 1, %s1087_s16  ;;  %s69_s19 = sadd.s32 1, %s1079_s14  ;;  %s1091_s17 = sphi %s1129_s17, %s18_s17   ;;  %s1087_s16 = sphi %s1127_s16, %s1294_s16   ;;  %s1083_s15 = sphi %s1125_s15, %s1293_s15   ;;  %s1079_s14 = sphi %s1123_s14, %s1292_s14   ;;  %s1075_s13 = sphi %s1121_s13, %s1291_s13   ;;  %s1071_s12 = sphi %s1119_s12, %s1290_s12  }
   0x7   : > { %p39_p0 = scmp.ge.s32.totalorder %s37_s18, 2  ;;  %p76_p1 = scmp.ne.s32.totalorder %s1079_s14, %s1075_s13 }
   0x8   : > { %p77_p2 = scmp.eq.s32.totalorder %s1091_s17, 0  ;;  %p848_p4 = scmp.lt.s32.totalorder %s1091_s17, 2 }
   0x9   : > { %s1296_s18 = smov (%p39_p0, %s37_s18), 0  ;;  %s172_s22 = sand.u32 1, %s1091_s17  }
   0xa   : > { %p1156_p3 = por %p77_p2, %p76_p1  ;;  %s62_s21 = ssub.s32 %s1087_s16, %s1296_s18 }
   0xb   : > { %p67_p5 = scmp.eq.s32.totalorder %s62_s21, 0  ;;  %s174_s23 = sand.u32 1, %s1079_s14  }
   0xc   : > { %s807_s24 = sshll.u32 %s1087_s16, 6  ;;  %s724_s26 = sshll.u32 %s174_s23, 6 }
   0xd   : > { %s1167_s25 = scalar_select %p67_p5, %s1079_s14, %s69_s19  }
   0xe   : > { %s184_s29 = scalar_lea.hbm %s1283_s1, %s807_s24  ;;  %s176_s4 = scalar_lea.vmem [#allocation7], %s724_s26 }
   0xf   : > { %s185_s30 = sshll.u32 %s184_s29, 4  ;;  %s187_s5 = sshll.u32 %s176_s4, 4  ;;  %s186_s30 = int_to_ptr.hbm [resolvable:$true] %s185_s30  ;;  %s188_s5 = int_to_ptr.vmem [resolvable:$true] %s187_s5 }
  0x10   : > { %p1176_p6 = pnand %p848_p4, %p1156_p3  ;;  %s173_s7 = scalar_lea.sflag [#allocation8], %s172_s22 }
  0x11   : > { %s1093_s8 = smov 64   ;;  %s1094_s9 = smov 4  }
  0x12   : > { %843 = dma.hbm_to_vmem [thread:$0]  (!%p1176_p6), %s186_s30, 1024, %s188_s5, %s173_s7, %s1093_s8, %s1093_s8, %s1094_s9  }
  0x13   : > { %s1183_s10 = sadd.s32 4294967295, %s1091_s17   ;;  %p82_p7 = scmp.ne.s32.totalorder %s1075_s13, %s1071_s12 }
  0x14   : > { %p83_p8 = scmp.eq.s32.totalorder %s1183_s10, 0  ;;  %p721_p9 = scmp.ge.s32.totalorder %s1091_s17, 1 }
  0x15   : > { %p147_p10 = scmp.lt.s32.totalorder %s1091_s17, 3  ;;  %s159_s22 = sshll.u32 %s1282_s0, 4  ;;  %s160_s22 = int_to_ptr.hbm [resolvable:$true] %s159_s22 }
  0x16   : > { %p1192_p11 = por %p83_p8, %p82_p7  ;;  %s1095_s12 = smov [#allocation4]  }
  0x17   : > { %p1196_p12 = pnand %p721_p9, %p147_p10  ;;  %s161_s24 = sshll.u32 %s1095_s12, 4  ;;  %s162_s24 = int_to_ptr.vmem [resolvable:$true] %s161_s24 }
  0x18   : > { %s727_s26 = sshll.u32 %s174_s23, 1  ;;  %s728_s27 = sshll.u32 %s1087_s16, 1 }
  0x19   : > { %p836_p13 = pneg %p1196_p12  ;;  %s201_s28 = scalar_lea.vmem [#allocation9], %s727_s26 }
  0x1a   : > { %s210_s29 = sshll.u32 %s201_s28, 4  ;;  %s206_s5 = scalar_lea.hbm %s1284_s2, %s728_s27  ;;  %s211_s29 = int_to_ptr.vmem [resolvable:$true] %s210_s29 }
  0x1b   : > { %p837_p0 = pnand %p836_p13, %p83_p8  ;;  %s208_s8 = sshll.u32 %s206_s5, 4  ;;  %s209_s8 = int_to_ptr.hbm [resolvable:$true] %s208_s8 }
  0x1c   : > { %846 = dma.hbm_to_vmem [thread:$0]  (!%p1176_p6), %s209_s8, 32, %s211_s29, %s173_s7  }
  0x1d   : > { %839 = dma.hbm_to_vmem [thread:$0]  (!%p837_p0), %s160_s22, 128, %s162_s24, [#allocation5]  }
  0x1e   : > { %219 = sbr.rel (%p1196_p12) target bundleno = 571 (0x23b), region = 32 }
  0x23   : > { %1058 = dma.done.wait (%p83_p8), [#allocation5], 128  }
  0x24   : > { %1060 = vsyncadd (%p83_p8), [#allocation5], 4294967168  ;;  %s226_s23 = sand.u32 1, %s1183_s10   ;;  %s228_s9 = sand.u32 1, %s1075_s13  }
  0x25   : > { %s731_s20 = sshll.u32 %s228_s9, 6  ;;  %s227_s21 = scalar_lea.sflag [#allocation8], %s226_s23 }
  0x26   : > { %s1221_s22 = scalar_lea.vmem [#allocation7], %s731_s20 }
  0x27   : > { %1062 = dma.done.wait (%p1192_p11), %s227_s21, 1056  }
  0x28   : > { %1064 = vsyncadd (%p1192_p11), %s227_s21, 4294966240  ;;  %s1227_s6 = sshll.u32 %s228_s9, 1  ;;  %v1096_v0 = vmov 0.0   ;;  %p733_p1 = scmp.ne.s32.totalorder %s1083_s15, 0 }
  0x29   : > { %271 = vst [vmem:[#allocation2] sm:$0xff] %v1096_v0  ;;  %s240_s7 = scalar_lea.vmem [#allocation9], %s1227_s6 }
  0x2a   : > { %275 = sbr.rel (%p733_p1) target bundleno = 213 (0xd5), region = 52 }
  0x2f   : > { %v815_v1 = vld [vmem:[%s1221_s22 + $0x38] sm:$0xff]  ;;  %v814_v2 = vld [vmem:[%s1221_s22 + $0x30] sm:$0xff]  ;;  %v813_v3 = vld [vmem:[%s1221_s22 + $0x28] sm:$0xff] }
  0x30   : > { %346 = vmatpush.bf16.msra.mxu0 %v815_v1  ;;  %v812_v4 = vld [vmem:[%s1221_s22 + $0x20] sm:$0xff]  ;;  %v811_v5 = vld [vmem:[%s1221_s22 + $0x18] sm:$0xff]  ;;  %v810_v6 = vld [vmem:[%s1221_s22 + $0x10] sm:$0xff] }
  0x31   : > { %v809_v7 = vld [vmem:[%s1221_s22 + $0x8] sm:$0xff]  ;;  %v808_v8 = vld [vmem:[%s1221_s22] sm:$0xff]  ;;  %v279_v9 = vld [vmem:[#allocation4] sm:$0xff] }
  0x32   : > { %v280_v10 = vpack.c.bf16 %v279_v9, %v279_v9  ;;  %v281_v11 = vld [vmem:[#allocation2] sm:$0xff] }
  0x34   : > { %347 = vmatpush.bf16.msra.mxu0 %v814_v2 }
  0x38   : > { %348 = vmatpush.bf16.msra.mxu0 %v813_v3 }
  0x3c   : > { %349 = vmatpush.bf16.msra.mxu0 %v812_v4 }
  0x40   : > { %350 = vmatpush.bf16.msra.mxu0 %v811_v5 }
  0x44   : > { %351 = vmatpush.bf16.msra.mxu0 %v810_v6 }
  0x48   : > { %352 = vmatpush.bf16.msra.mxu0 %v809_v7 }
  0x4c   : > { %353 = vmatpush.bf16.msra.mxu0 %v808_v8 }
  0x4f   : > { %354 = vmatmul.bf16.vlgmr.msra.gmra.mxu0 %v280_v10 }
  0xcc   : > { %v355_v12 = vpop.f32.mrf.mxu0 }
  0xcd   : > { %v359_v13 = vadd.f32 %v355_v12, %v281_v11 }
  0xcf   : > { %360 = vst [vmem:[#allocation2] sm:$0xff] %v359_v13 }
  0xd4   : > { %v357_v14 = vpop.f32.mrf.mxu0 }
  0xd5 PF: > { %p766_p2 = scmp.ne.s32.totalorder %s1083_s15, 1 }
  0xd7   : > { %364 = sbr.rel (%p766_p2) target bundleno = 386 (0x182), region = 56 }
  0xdc   : > { %v823_v15 = vld [vmem:[%s1221_s22 + $0x38] sm:$0xff]  ;;  %v822_v16 = vld [vmem:[%s1221_s22 + $0x30] sm:$0xff]  ;;  %v821_v17 = vld [vmem:[%s1221_s22 + $0x28] sm:$0xff] }
  0xdd   : > { %435 = vmatpush.bf16.msra.mxu0 %v823_v15  ;;  %v820_v18 = vld [vmem:[%s1221_s22 + $0x20] sm:$0xff]  ;;  %v819_v19 = vld [vmem:[%s1221_s22 + $0x18] sm:$0xff]  ;;  %v818_v20 = vld [vmem:[%s1221_s22 + $0x10] sm:$0xff] }
  0xde   : > { %v817_v21 = vld [vmem:[%s1221_s22 + $0x8] sm:$0xff]  ;;  %v816_v22 = vld [vmem:[%s1221_s22] sm:$0xff]  ;;  %v369_v23 = vld [vmem:[#allocation3] sm:$0xf] }
  0xdf   : > { %v370_v24 = vld [vmem:[#allocation2] sm:$0xff] }
  0xe1   : > { %436 = vmatpush.bf16.msra.mxu0 %v822_v16 }
  0xe5   : > { %437 = vmatpush.bf16.msra.mxu0 %v821_v17 }
  0xe9   : > { %438 = vmatpush.bf16.msra.mxu0 %v820_v18 }
  0xed   : > { %439 = vmatpush.bf16.msra.mxu0 %v819_v19 }
  0xf1   : > { %440 = vmatpush.bf16.msra.mxu0 %v818_v20 }
  0xf5   : > { %441 = vmatpush.bf16.msra.mxu0 %v817_v21 }
  0xf9   : > { %442 = vmatpush.bf16.msra.mxu0 %v816_v22 }
  0xfc   : > { %443 = vmatmul.bf16.vlgmr.msra.gmra.mxu0 %v369_v23 }
 0x179   : > { %v444_v25 = vpop.f32.mrf.mxu0 }
 0x17a   : > { %v448_v26 = vadd.f32 %v444_v25, %v370_v24 }
 0x17c   : > { %449 = vst [vmem:[#allocation2] sm:$0xff] %v448_v26 }
 0x181   : > { %v446_v27 = vpop.f32.mrf.mxu0 }
 0x182 PF: > { %v1097_v30 = vmov 8.0   ;;  %v454_v58 = vld [vmem:[%s240_s7] sm:$0x1]  ;;  %v906_v63 = vld [vmem:[%s240_s7 + $0x1] ss:$0 sm:$0xff] }
 0x183   : > { %v453_v28 = vld [vmem:[#allocation2] sm:$0xff]  ;;  %907 = vrcp.f32 %v1097_v30 }
 0x184   : > { %v456_v29 = vrot.slane %v453_v28, 4 }
 0x186   : > { %v457_v31 = vadd.f32 %v456_v29, %v453_v28 }
 0x188   : > { %v458_v32 = vrot.slane %v457_v31, 2 }
 0x189   : > { %v908_v33 = vpop.eup %907 }
 0x18a   : > { %v459_v34 = vadd.f32 %v458_v32, %v457_v31  ;;  %v463_v35 = vmul.f32 8.0, %v908_v33  ;;  %vm467_vm0 = vweird.f32 %v908_v33 }
 0x18c   : > { %v460_v36 = vrot.slane %v459_v34, 1  ;;  %v464_v37 = vsub.f32 1.0, %v463_v35 }
 0x18e   : > { %v465_v38 = vmul.f32 %v908_v33, %v464_v37  ;;  %v461_v39 = vadd.f32 %v460_v36, %v459_v34 }
 0x190   : > { %v466_v40 = vadd.f32 %v908_v33, %v465_v38 }
 0x192   : > { %v468_v41 = vsel %vm467_vm0, %v908_v33, %v466_v40 }
 0x193   : > { %v469_v42 = vmul.f32 %v468_v41, %v461_v39 }
 0x195   : > { %v470_v43 = vsub.f32 %v453_v28, %v469_v42 }
 0x197   : > { %v471_v44 = vmul.f32 %v470_v43, %v470_v43 }
 0x199   : > { %v472_v45 = vrot.slane %v471_v44, 4 }
 0x19b   : > { %v473_v46 = vadd.f32 %v472_v45, %v471_v44 }
 0x19d   : > { %v474_v47 = vrot.slane %v473_v46, 2 }
 0x19f   : > { %v475_v48 = vadd.f32 %v474_v47, %v473_v46 }
 0x1a1   : > { %v476_v49 = vrot.slane %v475_v48, 1 }
 0x1a3   : > { %v477_v50 = vadd.f32 %v476_v49, %v475_v48 }
 0x1a5   : > { %v478_v51 = vmul.f32 %v477_v50, %v468_v41 }
 0x1a7   : > { %v479_v52 = vadd.f32 1e-05, %v478_v51 }
 0x1a9   : > { %909 = vrsqrt.f32 %v479_v52  ;;  %vm486_vm1 = vweird.f32 %v479_v52 }
 0x1af   : > { %v910_v53 = vpop.eup %909 }
 0x1b0   : > { %v481_v54 = vmul.f32 %v910_v53, %v479_v52  ;;  %vm487_vm2 = vweird.f32 %v910_v53 }
 0x1b1   : > { %vm488_vm3 = vmor %vm486_vm1, %vm487_vm2 }
 0x1b2   : > { %v482_v55 = vmul.f32 %v910_v53, %v481_v54 }
 0x1b4   : > { %v483_v56 = vmul.f32 0.5, %v482_v55 }
 0x1b6   : > { %v484_v57 = vsub.f32 1.5, %v483_v56 }
 0x1b8   : > { %v485_v59 = vmul.f32 %v910_v53, %v484_v57 }
 0x1ba   : > { %v489_v60 = vsel %vm488_vm3, %v910_v53, %v485_v59 }
 0x1bb   : > { %v490_v61 = vmul.f32 %v489_v60, %v454_v58 }
 0x1bd   : > { %v491_v62 = vperm.slane %v490_v61, 0  ;;  %497 = sbr.rel (%p733_p1) target bundleno = 505 (0x1f9), region = 64 }
 0x1bf   : > { %v492_v0 = vmul.f32 %v491_v62, %v470_v43 }
 0x1c1   : > { %v494_v1 = vadd.f32 %v906_v63, %v492_v0 }
 0x1c3   : > { %v499_v2 = vmul.f32 0.70710677, %v494_v1  ;;  %v498_v37 = vmul.f32 0.5, %v494_v1 }
 0x1c5   : > { %v500_v3 = vmul.f32 %v499_v2, %v499_v2 }
 0x1c7   : > { %v501_v4 = vmin.f32 %v500_v3, 16.0 }
 0x1c9   : > { %v502_v5 = vmul.f32 2.1237322e-06, %v501_v4  ;;  %v513_v6 = vmul.f32 3.8918573e-05, %v501_v4 }
 0x1cb   : > { %v503_v7 = vadd.f32 0.00028619796, %v502_v5  ;;  %v514_v8 = vadd.f32 0.001143296, %v513_v6 }
 0x1cd   : > { %v504_v9 = vmul.f32 %v503_v7, %v501_v4  ;;  %v515_v10 = vmul.f32 %v514_v8, %v501_v4 }
 0x1cf   : > { %v505_v11 = vadd.f32 0.0036580483, %v504_v9  ;;  %v516_v12 = vadd.f32 0.014752088, %v515_v10 }
 0x1d1   : > { %v506_v13 = vmul.f32 %v505_v11, %v501_v4  ;;  %v517_v14 = vmul.f32 %v516_v12, %v501_v4 }
 0x1d3   : > { %v518_v15 = vadd.f32 0.112945676, %v517_v14  ;;  %v507_v16 = vadd.f32 0.05243302, %v506_v13 }
 0x1d5   : > { %v519_v17 = vmul.f32 %v518_v15, %v501_v4  ;;  %v508_v19 = vmul.f32 %v507_v16, %v501_v4 }
 0x1d7   : > { %v520_v18 = vadd.f32 0.4994258, %v519_v17  ;;  %v509_v22 = vadd.f32 0.18741608, %v508_v19 }
 0x1d9   : > { %v521_v20 = vmul.f32 %v520_v18, %v501_v4  ;;  %v510_v23 = vmul.f32 %v509_v22, %v501_v4 }
 0x1db   : > { %v522_v21 = vadd.f32 1.0, %v521_v20  ;;  %v511_v26 = vadd.f32 1.1283791, %v510_v23 }
 0x1dd   : > { %911 = vrcp.f32 %v522_v21  ;;  %v534_v27 = vand.u32 2147483648, %v522_v21  ;;  %vm528_vm4 = vweird.f32 %v522_v21  ;;  %v532_v29 = vand.u32 2147483647, %v522_v21 }
 0x1de   : > { %v512_v32 = vmul.f32 %v511_v26, %v499_v2 }
 0x1df   : > { %v535_v31 = vor.u32 1.1754944e-38, %v534_v27  ;;  %vm533_vm7 = vcmp.eq.f32.partialorder %v532_v29, 8.507059e+37 }
 0x1e3   : > { %v912_v24 = vpop.eup %911 }
 0x1e4   : > { %v524_v25 = vmul.f32 %v912_v24, %v522_v21  ;;  %vm529_vm5 = vweird.f32 %v912_v24 }
 0x1e5   : > { %vm530_vm6 = vmor %vm528_vm4, %vm529_vm5 }
 0x1e6   : > { %v525_v28 = vsub.f32 1.0, %v524_v25 }
 0x1e8   : > { %v526_v30 = vmul.f32 %v912_v24, %v525_v28 }
 0x1ea   : > { %v527_v33 = vadd.f32 %v912_v24, %v526_v30 }
 0x1ec   : > { %v531_v34 = vsel %vm530_vm6, %v912_v24, %v527_v33 }
 0x1ed   : > { %v536_v35 = vsel %vm533_vm7, %v535_v31, %v531_v34 }
 0x1ee   : > { %v537_v36 = vmul.f32 %v536_v35, %v512_v32 }
 0x1f0   : > { %v800_v38 = vclamps-f32 %v537_v36, 1.0 }
 0x1f2   : > { %v540_v39 = vadd.f32 1.0, %v800_v38 }
 0x1f4   : > { %v541_v40 = vmul.f32 %v540_v39, %v498_v37 }
 0x1f6   : > { %v542_v41 = vpack.c.bf16 %v541_v40, %v541_v40  ;;  %548 = vst [vmem:[#allocation10] sm:$0xff] %v541_v40 }
 0x1f8   : > { %547 = vst [vmem:[#allocation3] sm:$0xf] %v542_v41 }
 0x1f9 PF: > { %551 = sbr.rel (%p766_p2) target bundleno = 565 (0x235), region = 68 }
 0x1fe   : > { %v555_v42 = vld [vmem:[#allocation4] sm:$0xff] }
 0x1ff   : > { %v556_v43 = vadd.f32 %v555_v42, %v494_v1 }
 0x201   : > { %v558_v44 = vmul.f32 0.70710677, %v556_v43  ;;  %v557_v15 = vmul.f32 0.5, %v556_v43 }
 0x203   : > { %v559_v45 = vmul.f32 %v558_v44, %v558_v44 }
 0x205   : > { %v560_v46 = vmin.f32 %v559_v45, 16.0 }
 0x207   : > { %v561_v47 = vmul.f32 2.1237322e-06, %v560_v46  ;;  %v572_v48 = vmul.f32 3.8918573e-05, %v560_v46 }
 0x209   : > { %v562_v49 = vadd.f32 0.00028619796, %v561_v47  ;;  %v573_v50 = vadd.f32 0.001143296, %v572_v48 }
 0x20b   : > { %v563_v51 = vmul.f32 %v562_v49, %v560_v46  ;;  %v574_v52 = vmul.f32 %v573_v50, %v560_v46 }
 0x20d   : > { %v564_v53 = vadd.f32 0.0036580483, %v563_v51  ;;  %v575_v54 = vadd.f32 0.014752088, %v574_v52 }
 0x20f   : > { %v565_v55 = vmul.f32 %v564_v53, %v560_v46  ;;  %v576_v56 = vmul.f32 %v575_v54, %v560_v46 }
 0x211   : > { %v577_v57 = vadd.f32 0.112945676, %v576_v56  ;;  %v566_v58 = vadd.f32 0.05243302, %v565_v55 }
 0x213   : > { %v578_v59 = vmul.f32 %v577_v57, %v560_v46  ;;  %v567_v61 = vmul.f32 %v566_v58, %v560_v46 }
 0x215   : > { %v579_v60 = vadd.f32 0.4994258, %v578_v59  ;;  %v568_v0 = vadd.f32 0.18741608, %v567_v61 }
 0x217   : > { %v580_v62 = vmul.f32 %v579_v60, %v560_v46  ;;  %v569_v1 = vmul.f32 %v568_v0, %v560_v46 }
 0x219   : > { %v581_v63 = vadd.f32 1.0, %v580_v62  ;;  %v570_v4 = vadd.f32 1.1283791, %v569_v1 }
 0x21b   : > { %913 = vrcp.f32 %v581_v63  ;;  %v593_v5 = vand.u32 2147483648, %v581_v63  ;;  %vm587_vm8 = vweird.f32 %v581_v63  ;;  %v591_v7 = vand.u32 2147483647, %v581_v63 }
 0x21c   : > { %v571_v10 = vmul.f32 %v570_v4, %v558_v44 }
 0x21d   : > { %v594_v9 = vor.u32 1.1754944e-38, %v593_v5  ;;  %vm592_vm11 = vcmp.eq.f32.partialorder %v591_v7, 8.507059e+37 }
 0x221   : > { %v914_v2 = vpop.eup %913 }
 0x222   : > { %v583_v3 = vmul.f32 %v914_v2, %v581_v63  ;;  %vm588_vm9 = vweird.f32 %v914_v2 }
 0x223   : > { %vm589_vm10 = vmor %vm587_vm8, %vm588_vm9 }
 0x224   : > { %v584_v6 = vsub.f32 1.0, %v583_v3 }
 0x226   : > { %v585_v8 = vmul.f32 %v914_v2, %v584_v6 }
 0x228   : > { %v586_v11 = vadd.f32 %v914_v2, %v585_v8 }
 0x22a   : > { %v590_v12 = vsel %vm589_vm10, %v914_v2, %v586_v11 }
 0x22b   : > { %v595_v13 = vsel %vm592_vm11, %v594_v9, %v590_v12 }
 0x22c   : > { %v596_v14 = vmul.f32 %v595_v13, %v571_v10 }
 0x22e   : > { %v802_v16 = vclamps-f32 %v596_v14, 1.0 }
 0x230   : > { %v599_v17 = vadd.f32 1.0, %v802_v16 }
 0x232   : > { %v600_v18 = vmul.f32 %v599_v17, %v557_v15 }
 0x234   : > { %601 = vst [vmem:[#allocation10] sm:$0xff] %v600_v18 }
 0x235 PF: > { %p850_p3 = scmp.eq.s32.totalorder %s1183_s10, 1  ;;  %s612_s19 = sshll.u32 %s1285_s3, 4  ;;  %s613_s19 = int_to_ptr.hbm [resolvable:$true] %s612_s19 }
 0x236   : > { %s1098_s12 = smov [#allocation10]  }
 0x237   : > { %s610_s24 = sshll.u32 %s1098_s12, 4  ;;  %s611_s24 = int_to_ptr.vmem [resolvable:$true] %s610_s24 }
 0x238   : > { %833 = dma.vmem_to_hbm [thread:$0]  (%p850_p3), %s611_s24, 128, %s613_s19, [#allocation6]  }
 0x239   : > { %1066 = dma.done.wait (%p850_p3), [#allocation6], 128  }
 0x23a   : > { %1068 = vsyncadd (%p850_p3), [#allocation6], 4294967168 }
 0x23b PF: > { %s18_s17 = sadd.s32 1, %s1091_s17   ;;  %s1290_s12 = smov %s1075_s13 }
 0x23c   : > { %p15_p4 = scmp.ge.s32.totalorder %s18_s17, 4   ;;  %s1291_s13 = smov %s1079_s14 }
 0x23d   : > { %s1292_s14 = smov %s1167_s25  ;;  %s1293_s15 = smov %s1087_s16 }
 0x23e   : > { %s1294_s16 = smov %s1296_s18  ;;  %17 = sbr.rel (!%p15_p4) target bundleno = 6 (0x6), region = 114 }
 0x243   :  { %626 = vsyncpa [#allocation5], 1 }
 0x244   :  { %628 = vsyncpa [#allocation5 + $0x1], 1 }
 0x245   :  { %629 = vsyncpa [#allocation8], 1 }
 0x246   :  { %631 = vsyncpa [#allocation8 + $0x1], 1 }
 0x247   :  { %632 = vsyncpa [#allocation6], 1 }
 0x248   :  { %634 = vsyncpa [#allocation6 + $0x1], 1 }

</bundles_post_ra>
